<compile_context>
chip_gen: v5e
topology: v5e:2x2
jax: 0.10.0
libtpu: 0.0.40
codegen_flags: <defaults>
</compile_context>

<pallas_src>
import numpy as np

import jax
import jax.numpy as jnp
from jax.experimental import pallas as pl
from jax.experimental.pallas import tpu as pltpu


def _subsampling_kernel(x_ref, p2_ref, scale_ref, bias_ref, o_ref):
    # x_ref:     (RB, F*W)           packed input rows (lane-dense)
    # p2_ref:    (F*W, PO*Wo)        one-hot window-sum matrix (constant, resident)
    # scale_ref: (RB, 1), bias_ref: (RB, 1)   per-row (== per-channel) affine
    # o_ref:     (RB, PO*Wo)
    win_sum = jnp.dot(x_ref[...], p2_ref[...], preferred_element_type=jnp.float32)
    y = win_sum * scale_ref[...] + bias_ref[...]
    o_ref[...] = jax.nn.sigmoid(y).astype(o_ref.dtype)


def _packed_pool_matrix(f, w, kh, kw, sh, sw, po_n):
    """One-hot matrix P2 (f*w, po_n*wo): right-multiplying a packed row
    (f H-rows of width w) produces all window SUMS for those rows.
    Uses AvgPool2d floor ("VALID") behavior in both directions."""
    wo_n = (w - kw) // sw + 1
    m = np.zeros((f * w, po_n * wo_n), np.float32)
    for p in range(po_n):
        row_off = np.arange(p * sh, p * sh + kh) * w
        for wo in range(wo_n):
            col_off = np.arange(wo * sw, wo * sw + kw)
            m[np.add.outer(row_off, col_off).ravel(), p * wo_n + wo] = 1.0
    return m


def _choose_pack(h, w, wo, sh, sw, p2_cap_bytes=2 << 20):
    """Pick F (H-rows packed per flattened row): F % sh == 0, H % F == 0.
    Prefer the smallest F whose OUTPUT width (F/sh)*Wo is lane-dense (>= 128)
    while the constant pooling matrix stays tiny; otherwise the largest F whose
    pooling matrix still fits the cap (maximizes lane density of in/out rows)."""
    cands = [f for f in range(sh, h + 1, sh) if h % f == 0]

    def p2_bytes(f):
        return (f * w) * ((f // sh) * wo) * 4

    for f in cands:                      # lane-dense output, small P2
        if (f // sh) * wo >= 128 and p2_bytes(f) <= p2_cap_bytes:
            return f
    for f in reversed(cands):            # otherwise: widest rows that still fit
        if p2_bytes(f) <= p2_cap_bytes:
            return f
    return cands[0]


def _choose_rows_per_block(total_rows, row_bytes, target_bytes=1 << 20):
    """Rows per grid block: multiple of 8, divides total_rows, ~<=1 MiB per block
    (safe for v7x's smaller VMEM with double buffering), and >=2 blocks when
    possible so megacore can shard the parallel axis."""
    if total_rows <= 8 or total_rows % 8 != 0:
        return total_rows
    cap = max(8, min(total_rows, (target_bytes // max(row_bytes, 1)) // 8 * 8))
    best = None
    for rb in range(cap, 7, -8):
        if total_rows % rb == 0:
            best = rb
            break
    if best is None:
        return total_rows
    if best == total_rows:
        half = (total_rows // 2) // 8 * 8
        for rb in range(half, 7, -8):
            if total_rows % rb == 0:
                return rb
    return best


def subsampling_forward(x, weight, bias, kernel_size=(2, 2), stride=(2, 2)):
    """x: (N, C, H, W) float.  weight, bias: (C,) (depthwise 1x1 conv params)."""
    N, C, H, W = x.shape
    kh, kw = kernel_size
    sh, sw = stride
    weight = jnp.asarray(weight).reshape(-1).astype(jnp.float32)
    bias = jnp.asarray(bias).reshape(-1).astype(jnp.float32)

    Ho = (H - kh) // sh + 1
    Wo = (W - kw) // sw + 1

    if kh == sh and H % sh == 0:
        # Non-overlapping, evenly dividing H: pack F rows per slab row, pool
        # each packed group independently.
        F = _choose_pack(H, W, Wo, sh, sw)
        po_n = F // sh                       # pooled rows produced per packed row
    else:
        # Overlapping / ragged H windows: pack the whole channel into one row so
        # every window lives inside a single packed row.
        F = H
        po_n = Ho
        if (F * W) * (po_n * Wo) * 4 > (8 << 20):
            # TODO(synk): very large overlapping-pool channels need a streamed
            # (multi-pass) pooling matrix; the module default (2,2)/(2,2) and all
            # small/medium shapes never hit this path.
            raise NotImplementedError(
                "overlapping pooling matrix too large for VMEM-resident path")

    gpc = H // F                             # packed groups per channel
    total_rows = N * C * gpc
    in_cols = F * W
    out_cols = po_n * Wo

    # Free (contiguous) reshape of NCHW into the packed 2-D slab.
    x2 = x.reshape(total_rows, in_cols)
    p2 = jnp.asarray(_packed_pool_matrix(F, W, kh, kw, sh, sw, po_n), dtype=x.dtype)
    scale_rows = jnp.tile(jnp.repeat(weight, gpc), N).reshape(total_rows, 1)
    bias_rows = jnp.tile(jnp.repeat(bias, gpc), N).reshape(total_rows, 1)

    rb = _choose_rows_per_block(total_rows, in_cols * 4)
    grid = (total_rows // rb,)

    out2 = pl.pallas_call(
        _subsampling_kernel,
        out_shape=jax.ShapeDtypeStruct((total_rows, out_cols), x.dtype),
        grid_spec=pltpu.PrefetchScalarGridSpec(
            num_scalar_prefetch=0,
            grid=grid,
            in_specs=[
                pl.BlockSpec((rb, in_cols), lambda i: (i, 0)),        # packed input rows
                pl.BlockSpec((in_cols, out_cols), lambda i: (0, 0)),  # pooling matrix (resident)
                pl.BlockSpec((rb, 1), lambda i: (i, 0)),              # per-row scale
                pl.BlockSpec((rb, 1), lambda i: (i, 0)),              # per-row bias
            ],
            out_specs=pl.BlockSpec((rb, out_cols), lambda i: (i, 0)),
        ),
        compiler_params=pltpu.CompilerParams(dimension_semantics=("parallel",)),
    )(x2, p2, scale_rows, bias_rows)

    # Row/column ordering of out2 is exactly the row-major NCHW pooled tensor.
    return out2.reshape(N, C, Ho, Wo)


if __name__ == "__main__":
    key = jax.random.PRNGKey(0)
    k_x, k_w, k_b = jax.random.split(key, 3)

    N, C, H, W = 2, 4, 16, 16
    x = jax.random.normal(k_x, (N, C, H, W), jnp.float32)
    # Deterministic synthetic params for Conv2d(C, C, 1, groups=C, bias=True):
    # weight shape (C,1,1,1) squeezed to (C,), bias shape (C,).
    weight = jax.random.normal(k_w, (C,), jnp.float32) * 0.5
    bias = jax.random.normal(k_b, (C,), jnp.float32) * 0.1

    def ref_subsampling(x, w, b, ks, st):
        # AvgPool(k,s) * (kh*kw) == window sum (no padding, count_include_pad).
        win_sum = jax.lax.reduce_window(
            x, 0.0, jax.lax.add,
            (1, 1, ks[0], ks[1]), (1, 1, st[0], st[1]), "VALID")
        return jax.nn.sigmoid(win_sum * w[None, :, None, None] + b[None, :, None, None])

    # Default module config: kernel=(2,2), stride=(2,2)  (packed-group path).
    out = jax.block_until_ready(subsampling_forward(x, weight, bias))
    ref = ref_subsampling(x, weight, bias, (2, 2), (2, 2))
    assert out.shape == (N, C, H // 2, W // 2), out.shape
    assert jnp.allclose(out, ref, atol=1e-5, rtol=1e-5), float(jnp.abs(out - ref).max())

    # Overlapping-window config exercises the whole-channel packing path.
    out2 = jax.block_until_ready(
        subsampling_forward(x, weight, bias, kernel_size=(3, 3), stride=(2, 2)))
    ref2 = ref_subsampling(x, weight, bias, (3, 3), (2, 2))
    assert out2.shape == ref2.shape, (out2.shape, ref2.shape)
    assert jnp.allclose(out2, ref2, atol=1e-5, rtol=1e-5), float(jnp.abs(out2 - ref2).max())

    print("KERNEL_OK")
</pallas_src>

<mosaic_0001>
module attributes {stable_mosaic.version = 11 : i64} {
  func.func @_subsampling_kernel(%arg0: i32, %arg1: memref<8x256xf32, #tpu.memory_space<vmem>>, %arg2: memref<256x64xf32, #tpu.memory_space<vmem>>, %arg3: memref<8x1xf32, #tpu.memory_space<vmem>>, %arg4: memref<8x1xf32, #tpu.memory_space<vmem>>, %arg5: memref<8x64xf32, #tpu.memory_space<vmem>>) attributes {dimension_semantics = [#tpu.dimension_semantics<parallel>], iteration_bounds = array<i64: 1>, scalar_prefetch = 0 : i64, scratch_operands = 0 : i64, tpu.core_type = #tpu.core_type<tc>, window_params = [{transform_indices = @transform_0, window_bounds = array<i64: 8, 256>}, {pipeline_mode = #tpu.pipeline_mode<synchronous>, transform_indices = @transform_1, window_bounds = array<i64: 256, 64>}, {transform_indices = @transform_2, window_bounds = array<i64: 8, 1>}, {transform_indices = @transform_3, window_bounds = array<i64: 8, 1>}, {transform_indices = @transform_4, window_bounds = array<i64: 8, 64>}]} {
    %c0 = arith.constant 0 : index
    %c0_0 = arith.constant 0 : index
    %0 = vector.load %arg1[%c0, %c0_0] : memref<8x256xf32, #tpu.memory_space<vmem>>, vector<8x256xf32>
    %c0_1 = arith.constant 0 : index
    %c0_2 = arith.constant 0 : index
    %1 = vector.load %arg2[%c0_1, %c0_2] : memref<256x64xf32, #tpu.memory_space<vmem>>, vector<256x64xf32>
    %cst = arith.constant dense<0.000000e+00> : vector<8x64xf32>
    %2 = tpu.matmul %0, %1, %cst {dimension_numbers = #tpu.dot_dimension_numbers<[1], [0], [0], [1], [0, 0, 1, 1], [], []>} : vector<8x256xf32>, vector<256x64xf32>, vector<8x64xf32> -> vector<8x64xf32>
    %c0_3 = arith.constant 0 : index
    %c0_4 = arith.constant 0 : index
    %3 = vector.load %arg3[%c0_3, %c0_4] : memref<8x1xf32, #tpu.memory_space<vmem>>, vector<8x1xf32>
    %4 = vector.broadcast %3 : vector<8x1xf32> to vector<8x64xf32>
    %5 = arith.mulf %2, %4 : vector<8x64xf32>
    %c0_5 = arith.constant 0 : index
    %c0_6 = arith.constant 0 : index
    %6 = vector.load %arg4[%c0_5, %c0_6] : memref<8x1xf32, #tpu.memory_space<vmem>>, vector<8x1xf32>
    %7 = vector.broadcast %6 : vector<8x1xf32> to vector<8x64xf32>
    %8 = arith.addf %5, %7 : vector<8x64xf32>
    %9 = arith.negf %8 : vector<8x64xf32>
    %10 = math.exp %9 : vector<8x64xf32>
    %cst_7 = arith.constant 1.000000e+00 : f32
    %11 = vector.broadcast %cst_7 : f32 to vector<8x64xf32>
    %12 = arith.addf %11, %10 : vector<8x64xf32>
    %13 = arith.divf %11, %12 : vector<8x64xf32>
    %c0_8 = arith.constant 0 : index
    %c0_9 = arith.constant 0 : index
    %14 = vector.load %arg5[%c0_8, %c0_9] : memref<8x64xf32, #tpu.memory_space<vmem>>, vector<8x64xf32>
    tpu.vector_store %arg5[%c0_8, %c0_9], %13 {strides = array<i32>} : memref<8x64xf32, #tpu.memory_space<vmem>>, vector<8x64xf32>,
    return
  }
  func.func @transform_0(%arg0: i32) -> (i32, i32) {
    %c0_i32 = arith.constant 0 : i32
    %c0_i32_0 = arith.constant 0 : i32
    return %arg0, %c0_i32 : i32, i32
  }
  func.func @transform_1(%arg0: i32) -> (i32, i32) {
    %c0_i32 = arith.constant 0 : i32
    %c0_i32_0 = arith.constant 0 : i32
    %c0_i32_1 = arith.constant 0 : i32
    return %c0_i32, %c0_i32_0 : i32, i32
  }
  func.func @transform_2(%arg0: i32) -> (i32, i32) {
    %c0_i32 = arith.constant 0 : i32
    %c0_i32_0 = arith.constant 0 : i32
    return %arg0, %c0_i32 : i32, i32
  }
  func.func @transform_3(%arg0: i32) -> (i32, i32) {
    %c0_i32 = arith.constant 0 : i32
    %c0_i32_0 = arith.constant 0 : i32
    return %arg0, %c0_i32 : i32, i32
  }
  func.func @transform_4(%arg0: i32) -> (i32, i32) {
    %c0_i32 = arith.constant 0 : i32
    %c0_i32_0 = arith.constant 0 : i32
    return %arg0, %c0_i32 : i32, i32
  }
}

</mosaic_0001>

<bundles_post_ra>
// kernel: tpu_custom_call.1
= control target key start
LH: loop header
LB: loop body
LE: loop exit
PB: predicated region body
PF: predicated region fallthrough
CT: control target
= control target key end

     0   :  { %v177_v6 = vmov 0   ;;  %s315_s0 = inlined_call_operand.vmem [shape: f32[8,256], index: 0, kind: input, shape index: {}]   ;;  %s316_s1 = inlined_call_operand.vmem [shape: f32[256,64], index: 1, kind: input, shape index: {}]   ;;  %s317_s2 = inlined_call_operand.vmem [shape: f32[8,1], index: 2, kind: input, shape index: {}]   ;;  %s318_s3 = inlined_call_operand.vmem [shape: f32[8,1], index: 3, kind: input, shape index: {}]   ;;  %s319_s4 = inlined_call_operand.hbm [shape: f32[8,64], index: 4, kind: output, shape index: {}]  }
   0x1   :  { %v35_v0 = vld [vmem:[%s316_s1 + $0x78] sm:$0xff]  ;;  %v34_v2 = vld [vmem:[%s316_s1 + $0x70] sm:$0xff]  ;;  %v33_v4 = vld [vmem:[%s316_s1 + $0x68] sm:$0xff]  ;;  %146 = vset.pattern.permute.xlu0 %v177_v6 }
   0x2   :  { %v51_v1 = vld [vmem:[%s316_s1 + $0xf8] sm:$0xff]  ;;  %52 = vmatpush.msra.mxu0 %v35_v0  ;;  %v50_v3 = vld [vmem:[%s316_s1 + $0xf0] sm:$0xff]  ;;  %v49_v5 = vld [vmem:[%s316_s1 + $0xe8] sm:$0xff] }
   0x3   :  { %72 = vmatpush.msra.mxu1 %v51_v1  ;;  %v32_v7 = vld [vmem:[%s316_s1 + $0x60] sm:$0xff]  ;;  %v31_v9 = vld [vmem:[%s316_s1 + $0x58] sm:$0xff]  ;;  %v30_v11 = vld [vmem:[%s316_s1 + $0x50] sm:$0xff] }
   0x4   :  { %53 = vmatpush.msra.mxu0 %v34_v2  ;;  %v48_v8 = vld [vmem:[%s316_s1 + $0xe0] sm:$0xff]  ;;  %v47_v10 = vld [vmem:[%s316_s1 + $0xd8] sm:$0xff]  ;;  %v46_v12 = vld [vmem:[%s316_s1 + $0xd0] sm:$0xff] }
   0x5   :  { %73 = vmatpush.msra.mxu1 %v50_v3  ;;  %v29_v13 = vld [vmem:[%s316_s1 + $0x48] sm:$0xff]  ;;  %v92_v15 = vld [vmem:[%s317_s2] sm:$0xff] }
   0x6   :  { %54 = vmatpush.msra.mxu0 %v33_v4  ;;  %v45_v14 = vld [vmem:[%s316_s1 + $0xc8] sm:$0xff]  ;;  %v28_v16 = vld [vmem:[%s316_s1 + $0x40] sm:$0xff]  ;;  %95 = vperm.xlu0 %146, %v92_v15  }
   0x7   :  { %74 = vmatpush.msra.mxu1 %v49_v5  ;;  %v44_v17 = vld [vmem:[%s316_s1 + $0xc0] sm:$0xff] }
   0x8   :  { %55 = vmatpush.msra.mxu0 %v32_v7 }
   0x9   :  { %75 = vmatpush.msra.mxu1 %v48_v8 }
   0xa   :  { %56 = vmatpush.msra.mxu0 %v31_v9 }
   0xb   :  { %76 = vmatpush.msra.mxu1 %v47_v10 }
   0xc   :  { %57 = vmatpush.msra.mxu0 %v30_v11 }
   0xd   :  { %77 = vmatpush.msra.mxu1 %v46_v12 }
   0xe   :  { %9 = vsyncpa [#allocation3], 0  ;;  %58 = vmatpush.msra.mxu0 %v29_v13  ;;  %v27_v18 = vld [vmem:[%s316_s1 + $0x38] sm:$0xff]  ;;  %v26_v20 = vld [vmem:[%s316_s1 + $0x30] sm:$0xff]  ;;  %s134_s8 = sshll.u32 %s319_s4, 4  ;;  %vm125_vm3 = vcmask 523264   ;;  %s135_s8 = int_to_ptr.hbm [resolvable:$true] %s134_s8 }
   0xf   :  { %78 = vmatpush.msra.mxu1 %v45_v14  ;;  %v43_v19 = vld [vmem:[%s316_s1 + $0xb8] sm:$0xff]  ;;  %v42_v21 = vld [vmem:[%s316_s1 + $0xb0] sm:$0xff]  ;;  %v99_v22 = vld [vmem:[%s318_s3] sm:$0xff] }
  0x10   :  { %59 = vmatpush.msra.mxu0 %v28_v16  ;;  %v25_v23 = vld [vmem:[%s316_s1 + $0x28] sm:$0xff]  ;;  %v24_v25 = vld [vmem:[%s316_s1 + $0x20] sm:$0xff]  ;;  %102 = vperm.xlu0 %146, %v99_v22   ;;  %v23_v27 = vld [vmem:[%s316_s1 + $0x18] sm:$0xff] }
  0x11   :  { %79 = vmatpush.msra.mxu1 %v44_v17  ;;  %v41_v24 = vld [vmem:[%s316_s1 + $0xa8] sm:$0xff]  ;;  %v40_v26 = vld [vmem:[%s316_s1 + $0xa0] sm:$0xff]  ;;  %v39_v28 = vld [vmem:[%s316_s1 + $0x98] sm:$0xff] }
  0x12   :  { %60 = vmatpush.msra.mxu0 %v27_v18  ;;  %v22_v29 = vld [vmem:[%s316_s1 + $0x10] sm:$0xff]  ;;  %v21_v31 = vld [vmem:[%s316_s1 + $0x8] sm:$0xff]  ;;  %v20_v33 = vld [vmem:[%s316_s1] sm:$0xff] }
  0x13   :  { %80 = vmatpush.msra.mxu1 %v43_v19  ;;  %v38_v30 = vld [vmem:[%s316_s1 + $0x90] sm:$0xff]  ;;  %v37_v32 = vld [vmem:[%s316_s1 + $0x88] sm:$0xff]  ;;  %v36_v34 = vld [vmem:[%s316_s1 + $0x80] sm:$0xff] }
  0x14   :  { %61 = vmatpush.msra.mxu0 %v26_v20  ;;  %v18_v35 = vld [vmem:[%s315_s0] sm:$0xff]  ;;  %v19_v36 = vld [vmem:[%s315_s0 + $0x8] sm:$0xff]  ;;  %s178_s0 = smov [#allocation2]  }
  0x15   :  { %81 = vmatpush.msra.mxu1 %v42_v21  ;;  %s132_s1 = sshll.u32 %s178_s0, 4  ;;  %s133_s1 = int_to_ptr.vmem [resolvable:$true] %s132_s1 }
  0x16   :  { %62 = vmatpush.msra.mxu0 %v25_v23 }
  0x17   :  { %82 = vmatpush.msra.mxu1 %v41_v24 }
  0x18   :  { %63 = vmatpush.msra.mxu0 %v24_v25 }
  0x19   :  { %83 = vmatpush.msra.mxu1 %v40_v26 }
  0x1a   :  { %64 = vmatpush.msra.mxu0 %v23_v27 }
  0x1b   :  { %84 = vmatpush.msra.mxu1 %v39_v28 }
  0x1c   :  { %65 = vmatpush.msra.mxu0 %v22_v29 }
  0x1d   :  { %85 = vmatpush.msra.mxu1 %v38_v30 }
  0x1e   :  { %66 = vmatpush.msra.mxu0 %v21_v31 }
  0x1f   :  { %86 = vmatpush.msra.mxu1 %v37_v32 }
  0x20   :  { %67 = vmatpush.msra.mxu0 %v20_v33 }
  0x21   :  { %87 = vmatpush.msra.mxu1 %v36_v34  ;;  %68 = vmatmul.f32.vlgmr.msra.gmra.mxu0 %v18_v35 }
  0x22   :  { %88 = vmatmul.f32.vlgmr.msra.gmra.mxu1 %v19_v36 }
  0x78   :  { %v96_v37 = vpop.permute.xlu0 %95 }
  0x82   :  { %v103_v42 = vpop.permute.xlu0 %102 }
  0x9e   :  { %v69_v38 = vpop.f32.mrf.mxu0 }
  0x9f   :  { %v89_v39 = vpop.f32.mrf.mxu1 }
  0xa0   :  { %v90_v40 = vadd.f32 %v89_v39, %v69_v38 }
  0xa2   :  { %v98_v41 = vmul.f32 %v96_v37, %v90_v40 }
  0xa4   :  { %v105_v43 = vadd.f32 %v103_v42, %v98_v41 }
  0xa6   :  { %v143_v44 = vmul.f32 -1.442695, %v105_v43 }
  0xa8   :  { %147 = vpow2.f32 %v143_v44 }
  0xae   :  { %v148_v45 = vpop.eup %147 }
  0xaf   :  { %v109_v46 = vadd.f32 1.0, %v148_v45 }
  0xb1   :  { %149 = vrcp.f32 %v109_v46  ;;  %v121_v50 = vand.u32 2147483648, %v109_v46  ;;  %v119_v52 = vand.u32 2147483647, %v109_v46  ;;  %vm115_vm1 = vweird.f32 %v109_v46 }
  0xb3   :  { %v122_v54 = vor.u32 1.1754944e-38, %v121_v50  ;;  %vm120_vm4 = vcmp.eq.f32.partialorder %v119_v52, 8.507059e+37 }
  0xb7   :  { %v150_v47 = vpop.eup %149 }
  0xb8   :  { %v111_v48 = vmul.f32 %v150_v47, %v109_v46  ;;  %vm116_vm0 = vweird.f32 %v150_v47 }
  0xb9   :  { %vm117_vm2 = vmor %vm115_vm1, %vm116_vm0 }
  0xba   :  { %v112_v49 = vsub.f32 1.0, %v111_v48 }
  0xbc   :  { %v113_v51 = vmul.f32 %v150_v47, %v112_v49 }
  0xbe   :  { %v114_v53 = vadd.f32 %v150_v47, %v113_v51 }
  0xc0   :  { %v118_v55 = vsel %vm117_vm2, %v150_v47, %v114_v53 }
  0xc1   :  { %v123_v56 = vsel %vm120_vm4, %v122_v54, %v118_v55 }
  0xc2   :  { %126 = vst.msk [vmem:[#allocation2] sm:$0xff] %vm125_vm3, %v123_v56 }
  0xc3   :  { %137 = dma.vmem_to_hbm [thread:$0]  %s133_s1, 128, %s135_s8, [#allocation3]  }
  0xc4   :  { %175 = dma.done.wait [#allocation3], 128  }
  0xc5   :  { %176 = vsyncadd [#allocation3], 4294967168 }
  0xc6   :  { %142 = vsyncpa [#allocation3], 1 }

</bundles_post_ra>
